<compile_context>
chip_gen: v7x
topology: tpu7x:2x2x1
jax: 0.10.0
libtpu: 0.0.40
codegen_flags: <defaults>
</compile_context>

<pallas_src>
import functools

import jax
import jax.numpy as jnp
from jax.experimental import pallas as pl
from jax.experimental.pallas import tpu as pltpu


def _round_up(x: int, m: int) -> int:
    return ((x + m - 1) // m) * m


def _linear_logsoftmax_kernel(x_ref, w_ref, b_ref, o_ref):
    # (TB, D) bf16 @ (D, C_pad) bf16 on the MXU, f32 accumulation.
    logits = jnp.dot(x_ref[...], w_ref[...], preferred_element_type=jnp.float32)
    logits = logits + b_ref[...]  # (TB, C_pad) + (1, C_pad), f32 VPU broadcast add
    # Numerically-stable log-softmax along the class (lane) axis.
    # Padded class columns carry bias = -inf: they never win the max and
    # contribute exp(-inf) = 0 to the sum, so real-class results are exact.
    m = jnp.max(logits, axis=-1, keepdims=True)
    shifted = logits - m
    lse = jnp.log(jnp.sum(jnp.exp(shifted), axis=-1, keepdims=True))
    o_ref[...] = (shifted - lse).astype(o_ref.dtype)


def prepare_params(weight, bias, num_classes: int, input_dim: int):
    """One-time parameter prep (outside the hot path).

    weight: (num_classes, input_dim)  -- PyTorch nn.Linear layout
    bias:   (num_classes,)
    Returns:
      w_t_pad: (input_dim, C_pad) bf16, pre-transposed, padded classes are zero
      b_pad:   (1, C_pad) f32 bias, padded classes filled with -inf
    """
    c_pad = _round_up(num_classes, 128)
    w_t = weight.T.astype(jnp.bfloat16)  # transpose + cast once, not per call
    w_t_pad = (
        jnp.zeros((input_dim, c_pad), jnp.bfloat16)
        .at[:, :num_classes]
        .set(w_t)
    )
    b_pad = (
        jnp.full((1, c_pad), -jnp.inf, jnp.float32)
        .at[0, :num_classes]
        .set(bias.astype(jnp.float32))
    )
    return w_t_pad, b_pad


@functools.partial(jax.jit, static_argnames=("num_classes", "input_dim", "tile_b"))
def linear_logsoftmax(x, w_t_pad, b_pad, *, num_classes: int, input_dim: int,
                      tile_b: int = 1024):
    """Equivalent of LINEAR.forward: reshape(-1, input_dim) -> Linear -> LogSoftmax(dim=1)."""
    x2 = x.reshape(-1, input_dim).astype(jnp.bfloat16)  # bf16 input stream
    b_rows = x2.shape[0]
    _, c_pad = w_t_pad.shape

    # --- batch tiling: tb multiple of 8, bounded padding waste, >=2 tiles when
    # possible so the "parallel" axis shards across both v7x TensorCores. -----
    b8 = _round_up(max(b_rows, 1), 8)
    tile_b = max(8, _round_up(tile_b, 8))
    num_tiles = pl.cdiv(b8, tile_b)
    if b8 >= 16:
        num_tiles = max(num_tiles, 2)
    tb = _round_up(pl.cdiv(b8, num_tiles), 8)
    num_tiles = pl.cdiv(b8, tb)
    b_padded = num_tiles * tb

    # Pad batch rows only when actually needed (padded rows are zeros; they are
    # numerically harmless and sliced off below).
    if b_padded != b_rows:
        x2 = jnp.pad(x2, ((0, b_padded - b_rows), (0, 0)))

    # --- explicit VMEM budget (v7x has 64 MiB / 32 MiB default scoped) -------
    bytes_x_tile = tb * input_dim * 2        # bf16
    bytes_out_tile = tb * c_pad * 4          # f32
    bytes_w = input_dim * c_pad * 2          # bf16
    bytes_b = c_pad * 4
    needed = 2 * (bytes_x_tile + bytes_out_tile + bytes_w + bytes_b)  # double-buffered
    vmem_limit = int(min(max(2 * needed + (4 << 20), 16 << 20), 56 << 20))

    cost = pl.CostEstimate(
        flops=2 * b_padded * input_dim * c_pad,
        transcendentals=b_padded * c_pad,  # exp (log is per-row, negligible)
        bytes_accessed=(b_padded * input_dim * 2 + bytes_w + bytes_b
                        + b_padded * c_pad * 4),
    )

    out_pad = pl.pallas_call(
        _linear_logsoftmax_kernel,
        out_shape=jax.ShapeDtypeStruct((b_padded, c_pad), jnp.float32),
        grid=(num_tiles,),
        in_specs=[
            pl.BlockSpec((tb, input_dim), lambda i: (i, 0)),        # batch-tiled x (real K)
            pl.BlockSpec((input_dim, c_pad), lambda i: (0, 0)),     # VMEM-resident weight
            pl.BlockSpec((1, c_pad), lambda i: (0, 0)),             # VMEM-resident bias
        ],
        out_specs=pl.BlockSpec((tb, c_pad), lambda i: (i, 0)),      # lane-dense output
        compiler_params=pltpu.CompilerParams(
            dimension_semantics=("parallel",),                      # megacore-shardable batch
            vmem_limit_bytes=vmem_limit),
        cost_estimate=cost,
    )(x2, w_t_pad, b_pad)

    return out_pad[:b_rows, :num_classes]


if __name__ == "__main__":
    num_classes = 10
    input_dim = 32
    batch = 64

    key = jax.random.PRNGKey(0)
    kx, kw, kb = jax.random.split(key, 3)

    # Deterministic inputs/params (nn.Linear shapes: W (C, D), b (C,)).
    x = jax.random.normal(kx, (batch, input_dim), dtype=jnp.float32)
    bound = 1.0 / (input_dim ** 0.5)
    weight = jax.random.uniform(kw, (num_classes, input_dim),
                                minval=-bound, maxval=bound, dtype=jnp.float32)
    bias = jax.random.uniform(kb, (num_classes,),
                              minval=-bound, maxval=bound, dtype=jnp.float32)

    # One-time param prep (class-padding + transpose + bf16 cast), then hot path.
    w_t_pad, b_pad = prepare_params(weight, bias, num_classes, input_dim)
    out = linear_logsoftmax(x, w_t_pad, b_pad,
                            num_classes=num_classes, input_dim=input_dim)
    out = jax.block_until_ready(out)
    assert out.shape == (batch, num_classes)

    # Reference with bf16-rounded inputs (matches the kernel's bf16-in/f32-acc
    # matmul up to accumulation-order rounding).
    xb = x.astype(jnp.bfloat16).astype(jnp.float32)
    wb = weight.astype(jnp.bfloat16).astype(jnp.float32)
    ref_bf16 = jax.nn.log_softmax(xb @ wb.T + bias, axis=1)
    assert jnp.allclose(out, ref_bf16, atol=1e-3, rtol=1e-3)

    # Loose check against the full-f32 PyTorch-equivalent reference.
    ref_f32 = jax.nn.log_softmax(x @ weight.T + bias, axis=1)
    assert jnp.allclose(out, ref_f32, atol=5e-2, rtol=5e-2)

    print("KERNEL_OK")
</pallas_src>

<mosaic_0001>
module attributes {stable_mosaic.version = 11 : i64} {
  func.func @_linear_logsoftmax_kernel(%arg0: i32, %arg1: memref<32x32xbf16, #tpu.memory_space<vmem>>, %arg2: memref<32x128xbf16, #tpu.memory_space<vmem>>, %arg3: memref<1x128xf32, #tpu.memory_space<vmem>>, %arg4: memref<32x128xf32, #tpu.memory_space<vmem>>) attributes {dimension_semantics = [#tpu.dimension_semantics<parallel>], iteration_bounds = array<i64: 2>, scalar_prefetch = 0 : i64, scratch_operands = 0 : i64, tpu.core_type = #tpu.core_type<tc>, window_params = [{transform_indices = @transform_0, window_bounds = array<i64: 32, 32>}, {pipeline_mode = #tpu.pipeline_mode<synchronous>, transform_indices = @transform_1, window_bounds = array<i64: 32, 128>}, {pipeline_mode = #tpu.pipeline_mode<synchronous>, transform_indices = @transform_2, window_bounds = array<i64: 1, 128>}, {transform_indices = @transform_3, window_bounds = array<i64: 32, 128>}]} {
    %c0 = arith.constant 0 : index
    %c0_0 = arith.constant 0 : index
    %0 = vector.load %arg1[%c0, %c0_0] : memref<32x32xbf16, #tpu.memory_space<vmem>>, vector<32x32xbf16>
    %c0_1 = arith.constant 0 : index
    %c0_2 = arith.constant 0 : index
    %1 = vector.load %arg2[%c0_1, %c0_2] : memref<32x128xbf16, #tpu.memory_space<vmem>>, vector<32x128xbf16>
    %cst = arith.constant dense<0.000000e+00> : vector<32x128xf32>
    %2 = tpu.matmul %0, %1, %cst {dimension_numbers = #tpu.dot_dimension_numbers<[1], [0], [0], [1], [0, 0, 1, 1], [], []>} : vector<32x32xbf16>, vector<32x128xbf16>, vector<32x128xf32> -> vector<32x128xf32>
    %c0_3 = arith.constant 0 : index
    %c0_4 = arith.constant 0 : index
    %3 = vector.load %arg3[%c0_3, %c0_4] : memref<1x128xf32, #tpu.memory_space<vmem>>, vector<1x128xf32>
    %4 = vector.broadcast %3 : vector<1x128xf32> to vector<32x128xf32>
    %5 = arith.addf %2, %4 : vector<32x128xf32>
    %cst_5 = arith.constant dense<0xFF800000> : vector<32xf32>
    %6 = vector.multi_reduction <maximumf>, %5, %cst_5 [1] : vector<32x128xf32> to vector<32xf32>
    %7 = vector.shape_cast %6 : vector<32xf32> to vector<32x1xf32>
    %8 = vector.broadcast %7 : vector<32x1xf32> to vector<32x128xf32>
    %9 = arith.subf %5, %8 : vector<32x128xf32>
    %10 = math.exp %9 : vector<32x128xf32>
    %cst_6 = arith.constant dense<0.000000e+00> : vector<32xf32>
    %11 = vector.multi_reduction <add>, %10, %cst_6 [1] : vector<32x128xf32> to vector<32xf32>
    %12 = vector.shape_cast %11 : vector<32xf32> to vector<32x1xf32>
    %13 = math.log %12 : vector<32x1xf32>
    %14 = vector.broadcast %13 : vector<32x1xf32> to vector<32x128xf32>
    %15 = arith.subf %9, %14 : vector<32x128xf32>
    %c0_7 = arith.constant 0 : index
    %c0_8 = arith.constant 0 : index
    %16 = vector.load %arg4[%c0_7, %c0_8] : memref<32x128xf32, #tpu.memory_space<vmem>>, vector<32x128xf32>
    tpu.vector_store %arg4[%c0_7, %c0_8], %15 {strides = array<i32>} : memref<32x128xf32, #tpu.memory_space<vmem>>, vector<32x128xf32>,
    return
  }
  func.func @transform_0(%arg0: i32) -> (i32, i32) {
    %c0_i32 = arith.constant 0 : i32
    %c0_i32_0 = arith.constant 0 : i32
    return %arg0, %c0_i32 : i32, i32
  }
  func.func @transform_1(%arg0: i32) -> (i32, i32) {
    %c0_i32 = arith.constant 0 : i32
    %c0_i32_0 = arith.constant 0 : i32
    %c0_i32_1 = arith.constant 0 : i32
    return %c0_i32, %c0_i32_0 : i32, i32
  }
  func.func @transform_2(%arg0: i32) -> (i32, i32) {
    %c0_i32 = arith.constant 0 : i32
    %c0_i32_0 = arith.constant 0 : i32
    %c0_i32_1 = arith.constant 0 : i32
    return %c0_i32, %c0_i32_0 : i32, i32
  }
  func.func @transform_3(%arg0: i32) -> (i32, i32) {
    %c0_i32 = arith.constant 0 : i32
    %c0_i32_0 = arith.constant 0 : i32
    return %arg0, %c0_i32 : i32, i32
  }
}

</mosaic_0001>

<bundles_post_ra>
// kernel: linear_logsoftmax.1
= control target key start
LH: loop header
LB: loop body
LE: loop exit
PB: predicated region body
PF: predicated region fallthrough
CT: control target
= control target key end

     0   :  { %s454_s12 = smov 0   ;;  %s484_s0 = inlined_call_operand.vmem [shape: bf16[64,32], index: 0, kind: input, shape index: {}]   ;;  %s485_s1 = inlined_call_operand.vmem [shape: bf16[32,128], index: 1, kind: input, shape index: {}]   ;;  %s486_s2 = inlined_call_operand.vmem [shape: f32[1,128], index: 2, kind: input, shape index: {}]   ;;  %s487_s3 = inlined_call_operand.vmem [shape: f32[64,128], index: 3, kind: output, shape index: {}]  }
   0x1 LB: > { %s368_s13 = sadd.s32 4294967295, %s432_s12   ;;  %p372_p0 = scmp.ge.s32.totalorder %s432_s12, 1  ;;  %s432_s12 = sphi %s454_s12, %s13_s12  }
   0x2   : > { %p138_p1 = scmp.lt.s32.totalorder %s432_s12, 3 }
   0x4   : > { %p139_p2 = pnand %p372_p0, %p138_p1 }
   0x5   : > { %v406_v0 = vld [vmem:[%s485_s1] sm:$0xff] (!%p139_p2)   ;;  %s373_s16 = sshll.u32 (!%p139_p2), %s368_s13, 2  ;;  %v407_v1 = vld [vmem:[%s485_s1 + $0x8] sm:$0xff] (!%p139_p2)   ;;  %vm212_vm0 = vcmask (!%p139_p2), 261120  }
   0x6   : > { %142 = sbr.rel (%p139_p2) target bundleno = 556 (0x22c), region = 32  ;;  %p163_p3 = scmp.lt.s32.totalorder (!%p139_p2), %s373_s16, 7  ;;  %390 = vmatprep.subr.bf16.mxu0 (!%p139_p2), %v406_v0  ;;  %v377_v4 = vld [vmem:[%s486_s2] ss:$0 sm:$0xff] (!%p139_p2) }
   0x7   : > { %391 = vmatpush3.bf16.msra.mxu0 (!%p139_p2), %v406_v0 }
   0x8   : > { %392 = vmatprep.subr.bf16.mxu0 (!%p139_p2), %v407_v1 }
   0xb   : > { %393 = vmatpush3.bf16.msra.mxu0 (!%p139_p2), %v407_v1 }
   0xd   : > { %s489_s16 = smov (!%p163_p3, %s373_s16), 7 }
   0xe   : > { %s374_s19 = sshll.u32 %s489_s16, 2  ;;  %s376_s25 = sshll.u32 %s489_s16, 3 }
   0xf   : > { %s166_s22 = scalar_lea.vmem %s484_s0, %s374_s19  ;;  %s172_s28 = scalar_lea.vmem %s487_s3, %s376_s25 }
  0x10   : > { %v408_v2 = vld [vmem:[%s166_s22] sm:$0xff]   ;;  %v409_v3 = vld [vmem:[%s166_s22 + $0x8] sm:$0xff]  }
  0x11   : > { %394 = vmatprep.mubr.msk.bf16.mxu0 %vm212_vm0, %v408_v2 }
  0x12   : > { %395 = vmatmul.mubr.msk.bf16.vlgmr.msra.gmra.mrb[0].mxu0 %vm212_vm0, %v409_v3 }
  0xe5   : > { %v396_v5 = vpop.f32.mrb[0].mxu0 }
  0xe6   : > { %v262_v6 = vadd.f32 %v396_v5, %v377_v4  ;;  %v253_v7 = vpop.f32.mrb[1].mxu0 }
  0xe7   : > { %v254_v8 = vadd.f32 %v377_v4, %v253_v7  ;;  %v397_v9 = vpop.f32.mrb[2].mxu0 }
  0xe8   : > { %272 = vmax.xlane.f32.xlu1 %v262_v6  ;;  %v256_v10 = vpop.f32.mrb[3].mxu0  ;;  %v265_v11 = vadd.f32 %v397_v9, %v377_v4 }
  0xe9   : > { %268 = vmax.xlane.f32.xlu0 %v254_v8  ;;  %v257_v12 = vadd.f32 %v377_v4, %v256_v10 }
  0xec   : > { %274 = vmax.xlane.f32.xlu1 %v265_v11 }
  0xed   : > { %270 = vmax.xlane.f32.xlu0 %v257_v12 }
 0x175   : > { %v273_v13 = vpop.xlane.xlu1 %272 }
 0x176   : > { %v278_v14 = vsub.f32 %v262_v6, %v273_v13  ;;  %v269_v15 = vpop.xlane.xlu0 %268 }
 0x177   : > { %v276_v16 = vsub.f32 %v254_v8, %v269_v15 }
 0x178   : > { %v284_v19 = vmul.f32 1.442695, %v278_v14 }
 0x179   : > { %v280_v17 = vmul.f32 1.442695, %v276_v16  ;;  %v275_v18 = vpop.xlane.xlu1 %274 }
 0x17a   : > { %v271_v20 = vpop.xlane.xlu0 %270  ;;  %v279_v21 = vsub.f32 %v265_v11, %v275_v18 }
 0x17b   : > { %410 = vpow2.f32 %v280_v17  ;;  %v277_v22 = vsub.f32 %v257_v12, %v271_v20 }
 0x17c   : > { %412 = vpow2.f32 %v284_v19  ;;  %v286_v24 = vmul.f32 1.442695, %v279_v21 }
 0x17d   : > { %v282_v23 = vmul.f32 1.442695, %v277_v22 }
 0x17f   : > { %414 = vpow2.f32 %v282_v23 }
 0x180   : > { %416 = vpow2.f32 %v286_v24 }
 0x185   : > { %v411_v25 = vpop.eup %410 }
 0x186   : > { %288 = vadd.xlane.f32.xlu0 %v411_v25  ;;  %v413_v26 = vpop.eup %412 }
 0x189   : > { %v415_v27 = vpop.eup %414 }
 0x18a   : > { %292 = vadd.xlane.f32.xlu0 %v413_v26  ;;  %290 = vadd.xlane.f32.xlu1 %v415_v27  ;;  %v417_v28 = vpop.eup %416 }
 0x18e   : > { %294 = vadd.xlane.f32.xlu1 %v417_v28 }
 0x213   : > { %v289_v29 = vpop.xlane.xlu0 %288 }
 0x214   : > { %418 = vlog2.f32 %v289_v29 }
 0x217   : > { %v291_v30 = vpop.xlane.xlu1 %290  ;;  %v293_v31 = vpop.xlane.xlu0 %292 }
 0x218   : > { %420 = vlog2.f32 %v291_v30 }
 0x219   : > { %422 = vlog2.f32 %v293_v31 }
 0x21b   : > { %v295_v32 = vpop.xlane.xlu1 %294 }
 0x21c   : > { %424 = vlog2.f32 %v295_v32 }
 0x21e   : > { %v419_v33 = vpop.eup %418 }
 0x21f   : > { %v297_v34 = vmul.f32 0.6931472, %v419_v33 }
 0x221   : > { %v304_v35 = vsub.f32 %v276_v16, %v297_v34 }
 0x222   : > { %v421_v36 = vpop.eup %420 }
 0x223   : > { %v423_v37 = vpop.eup %422  ;;  %308 = vst [vmem:[%s172_s28] sm:$0xff] %v304_v35  ;;  %v299_v38 = vmul.f32 0.6931472, %v421_v36 }
 0x224   : > { %v301_v39 = vmul.f32 0.6931472, %v423_v37 }
 0x225   : > { %v305_v40 = vsub.f32 %v277_v22, %v299_v38 }
 0x226   : > { %v425_v41 = vpop.eup %424  ;;  %v306_v42 = vsub.f32 %v278_v14, %v301_v39 }
 0x227   : > { %309 = vst [vmem:[%s172_s28 + $0x8] sm:$0xff] %v305_v40  ;;  %v303_v43 = vmul.f32 0.6931472, %v425_v41 }
 0x228   : > { %310 = vst [vmem:[%s172_s28 + $0x10] sm:$0xff] %v306_v42 }
 0x229   : > { %v307_v44 = vsub.f32 %v279_v21, %v303_v43 }
 0x22b   : > { %311 = vst [vmem:[%s172_s28 + $0x18] sm:$0xff] %v307_v44 }
 0x22c PF: > { %s13_s12 = sadd.s32 1, %s432_s12  }
 0x22d   : > { %p10_p4 = scmp.ge.s32.totalorder %s13_s12, 4  }
 0x22f   :  { %12 = sbr.rel (!%p10_p4) target bundleno = 1 (0x1), region = 62 }

</bundles_post_ra>
